<compile_context>
chip_gen: v7x
topology: tpu7x:2x2x1
jax: 0.10.0
libtpu: 0.0.40
codegen_flags: <defaults>
</compile_context>

<pallas_src>
import jax
import jax.numpy as jnp
import numpy as np
from jax.experimental import pallas as pl
from jax.experimental.pallas import tpu as pltpu

NS = 11        # Hopper-v3 observation dim
NA = 3         # Hopper-v3 action dim
HIDDEN = 256
OUT_PAD = 128  # lane-dense padded output width (>= NA, multiple of 128)


def _round_up(x, m):
    return ((x + m - 1) // m) * m


def actor_kernel(x_ref, w1_ref, b1_ref, w2_ref, b2_ref, w3_ref, b3_ref, o_ref):
    # MXU operands in bf16, f32 accumulate; epilogue (bias/ReLU/tanh) in f32.
    x = x_ref[...].astype(jnp.bfloat16)

    # fc1 + ReLU
    h1 = jnp.dot(x, w1_ref[...], preferred_element_type=jnp.float32) + b1_ref[...]
    h1 = jnp.maximum(h1, 0.0)

    # fc2 + ReLU
    h2 = jnp.dot(h1.astype(jnp.bfloat16), w2_ref[...],
                 preferred_element_type=jnp.float32) + b2_ref[...]
    h2 = jnp.maximum(h2, 0.0)

    # fc3 (lane-padded to 128) + tanh (EUP)
    out = jnp.dot(h2.astype(jnp.bfloat16), w3_ref[...],
                  preferred_element_type=jnp.float32) + b3_ref[...]
    o_ref[...] = jnp.tanh(out).astype(o_ref.dtype)


def actor_forward(x, params, tb=256):
    """x: (B, NS) f32. Returns (B, NA) f32 actions in (-1, 1)."""
    w1, b1, w2, b2, w3, b3 = params  # w*: bf16, b*: f32; w3/b3 lane-padded to OUT_PAD
    B = x.shape[0]

    # Batch tile: multiple of 8 sublanes, at most `tb` (default 256 -> fills MXU M dim).
    tb = min(tb, _round_up(max(B, 1), 8))
    b_pad = _round_up(B, tb)
    if b_pad != B:
        x = jnp.pad(x, ((0, b_pad - B), (0, 0)))
    grid = (b_pad // tb,)

    # Weights/biases: same block (0, 0) every grid step -> VMEM-resident, DMA'd once.
    def resident(a):
        nd = a.ndim
        return pl.BlockSpec(a.shape, lambda i, _nd=nd: (0,) * _nd)

    out = pl.pallas_call(
        actor_kernel,
        out_shape=jax.ShapeDtypeStruct((b_pad, OUT_PAD), jnp.float32),
        grid=grid,
        in_specs=[
            pl.BlockSpec((tb, NS), lambda i: (i, 0)),   # x: tiled over batch
            resident(w1), resident(b1),
            resident(w2), resident(b2),
            resident(w3), resident(b3),
        ],
        out_specs=pl.BlockSpec((tb, OUT_PAD), lambda i: (i, 0)),
        compiler_params=pltpu.CompilerParams(
            dimension_semantics=("parallel",),          # v7x: shard batch across both TCs
        ),
    )(x, w1, b1, w2, b2, w3, b3)

    return out[:B, :NA]


def init_params(key):
    """PyTorch nn.Linear default init U(-1/sqrt(fan_in), 1/sqrt(fan_in)).
    Weights cast to bf16 (MXU operands); biases kept f32 (epilogue).
    fc3 weight/bias zero-padded to OUT_PAD lanes for a lane-dense output store."""
    ks = jax.random.split(key, 6)

    def linear(kw, kb, fan_in, fan_out):
        bound = 1.0 / np.sqrt(fan_in)
        w = jax.random.uniform(kw, (fan_in, fan_out), jnp.float32, -bound, bound)
        b = jax.random.uniform(kb, (1, fan_out), jnp.float32, -bound, bound)
        return w, b

    w1, b1 = linear(ks[0], ks[1], NS, HIDDEN)
    w2, b2 = linear(ks[2], ks[3], HIDDEN, HIDDEN)
    w3, b3 = linear(ks[4], ks[5], HIDDEN, NA)

    # Zero-pad fc3 output dim NA -> OUT_PAD (padding columns contribute nothing real;
    # the wrapper slices [:, :NA]).
    w3 = jnp.pad(w3, ((0, 0), (0, OUT_PAD - NA)))
    b3 = jnp.pad(b3, ((0, 0), (0, OUT_PAD - NA)))

    w1 = w1.astype(jnp.bfloat16)
    w2 = w2.astype(jnp.bfloat16)
    w3 = w3.astype(jnp.bfloat16)
    return (w1, b1, w2, b2, w3, b3)


def actor_reference(x, params):
    """Pure-JAX reference mirroring the kernel's precision (bf16 MXU operands, f32 accum)."""
    w1, b1, w2, b2, w3, b3 = params
    f32 = jnp.float32
    h1 = jnp.maximum(
        jnp.dot(x.astype(jnp.bfloat16), w1, preferred_element_type=f32) + b1, 0.0)
    h2 = jnp.maximum(
        jnp.dot(h1.astype(jnp.bfloat16), w2, preferred_element_type=f32) + b2, 0.0)
    out = jnp.tanh(
        jnp.dot(h2.astype(jnp.bfloat16), w3, preferred_element_type=f32) + b3)
    return out[:, :NA]


if __name__ == "__main__":
    key = jax.random.PRNGKey(0)
    k_params, k_x = jax.random.split(key)

    params = init_params(k_params)

    # Small deterministic batch of observations.
    B = 8
    x = jax.random.normal(k_x, (B, NS), dtype=jnp.float32)

    out = actor_forward(x, params)
    out = jax.block_until_ready(out)

    ref = actor_reference(x, params)
    np.testing.assert_allclose(np.asarray(out), np.asarray(ref), rtol=2e-3, atol=2e-3)
    assert out.shape == (B, NA)
    assert bool(jnp.all(jnp.abs(out) <= 1.0))  # tanh range

    # Also check the padded path (B not a multiple of the 8-row sublane tile).
    x_small = jax.random.normal(jax.random.PRNGKey(1), (5, NS), dtype=jnp.float32)
    out_small = jax.block_until_ready(actor_forward(x_small, params))
    np.testing.assert_allclose(np.asarray(out_small),
                               np.asarray(actor_reference(x_small, params)),
                               rtol=2e-3, atol=2e-3)
    assert out_small.shape == (5, NA)

    print("KERNEL_OK")
</pallas_src>

<mosaic_0001>
module attributes {stable_mosaic.version = 11 : i64} {
  func.func @actor_kernel(%arg0: i32, %arg1: memref<8x11xf32, #tpu.memory_space<vmem>>, %arg2: memref<11x256xbf16, #tpu.memory_space<vmem>>, %arg3: memref<1x256xf32, #tpu.memory_space<vmem>>, %arg4: memref<256x256xbf16, #tpu.memory_space<vmem>>, %arg5: memref<1x256xf32, #tpu.memory_space<vmem>>, %arg6: memref<256x128xbf16, #tpu.memory_space<vmem>>, %arg7: memref<1x128xf32, #tpu.memory_space<vmem>>, %arg8: memref<8x128xf32, #tpu.memory_space<vmem>>) attributes {dimension_semantics = [#tpu.dimension_semantics<parallel>], iteration_bounds = array<i64: 1>, scalar_prefetch = 0 : i64, scratch_operands = 0 : i64, tpu.core_type = #tpu.core_type<tc>, window_params = [{transform_indices = @transform_0, window_bounds = array<i64: 8, 11>}, {pipeline_mode = #tpu.pipeline_mode<synchronous>, transform_indices = @transform_1, window_bounds = array<i64: 11, 256>}, {pipeline_mode = #tpu.pipeline_mode<synchronous>, transform_indices = @transform_2, window_bounds = array<i64: 1, 256>}, {pipeline_mode = #tpu.pipeline_mode<synchronous>, transform_indices = @transform_3, window_bounds = array<i64: 256, 256>}, {pipeline_mode = #tpu.pipeline_mode<synchronous>, transform_indices = @transform_4, window_bounds = array<i64: 1, 256>}, {pipeline_mode = #tpu.pipeline_mode<synchronous>, transform_indices = @transform_5, window_bounds = array<i64: 256, 128>}, {pipeline_mode = #tpu.pipeline_mode<synchronous>, transform_indices = @transform_6, window_bounds = array<i64: 1, 128>}, {transform_indices = @transform_7, window_bounds = array<i64: 8, 128>}]} {
    %c0 = arith.constant 0 : index
    %c0_0 = arith.constant 0 : index
    %0 = vector.load %arg1[%c0, %c0_0] : memref<8x11xf32, #tpu.memory_space<vmem>>, vector<8x11xf32>
    %1 = arith.truncf %0 : vector<8x11xf32> to vector<8x11xbf16>
    %c0_1 = arith.constant 0 : index
    %c0_2 = arith.constant 0 : index
    %2 = vector.load %arg2[%c0_1, %c0_2] : memref<11x256xbf16, #tpu.memory_space<vmem>>, vector<11x256xbf16>
    %cst = arith.constant dense<0.000000e+00> : vector<8x256xf32>
    %3 = tpu.matmul %1, %2, %cst {dimension_numbers = #tpu.dot_dimension_numbers<[1], [0], [0], [1], [0, 0, 1, 1], [], []>} : vector<8x11xbf16>, vector<11x256xbf16>, vector<8x256xf32> -> vector<8x256xf32>
    %c0_3 = arith.constant 0 : index
    %c0_4 = arith.constant 0 : index
    %4 = vector.load %arg3[%c0_3, %c0_4] : memref<1x256xf32, #tpu.memory_space<vmem>>, vector<1x256xf32>
    %5 = vector.broadcast %4 : vector<1x256xf32> to vector<8x256xf32>
    %6 = arith.addf %3, %5 : vector<8x256xf32>
    %cst_5 = arith.constant 0.000000e+00 : f32
    %7 = vector.broadcast %cst_5 : f32 to vector<8x256xf32>
    %8 = arith.maximumf %6, %7 : vector<8x256xf32>
    %9 = arith.truncf %8 : vector<8x256xf32> to vector<8x256xbf16>
    %c0_6 = arith.constant 0 : index
    %c0_7 = arith.constant 0 : index
    %10 = vector.load %arg4[%c0_6, %c0_7] : memref<256x256xbf16, #tpu.memory_space<vmem>>, vector<256x256xbf16>
    %cst_8 = arith.constant dense<0.000000e+00> : vector<8x256xf32>
    %11 = tpu.matmul %9, %10, %cst_8 {dimension_numbers = #tpu.dot_dimension_numbers<[1], [0], [0], [1], [0, 0, 1, 1], [], []>} : vector<8x256xbf16>, vector<256x256xbf16>, vector<8x256xf32> -> vector<8x256xf32>
    %c0_9 = arith.constant 0 : index
    %c0_10 = arith.constant 0 : index
    %12 = vector.load %arg5[%c0_9, %c0_10] : memref<1x256xf32, #tpu.memory_space<vmem>>, vector<1x256xf32>
    %13 = vector.broadcast %12 : vector<1x256xf32> to vector<8x256xf32>
    %14 = arith.addf %11, %13 : vector<8x256xf32>
    %cst_11 = arith.constant 0.000000e+00 : f32
    %15 = vector.broadcast %cst_11 : f32 to vector<8x256xf32>
    %16 = arith.maximumf %14, %15 : vector<8x256xf32>
    %17 = arith.truncf %16 : vector<8x256xf32> to vector<8x256xbf16>
    %c0_12 = arith.constant 0 : index
    %c0_13 = arith.constant 0 : index
    %18 = vector.load %arg6[%c0_12, %c0_13] : memref<256x128xbf16, #tpu.memory_space<vmem>>, vector<256x128xbf16>
    %cst_14 = arith.constant dense<0.000000e+00> : vector<8x128xf32>
    %19 = tpu.matmul %17, %18, %cst_14 {dimension_numbers = #tpu.dot_dimension_numbers<[1], [0], [0], [1], [0, 0, 1, 1], [], []>} : vector<8x256xbf16>, vector<256x128xbf16>, vector<8x128xf32> -> vector<8x128xf32>
    %c0_15 = arith.constant 0 : index
    %c0_16 = arith.constant 0 : index
    %20 = vector.load %arg7[%c0_15, %c0_16] : memref<1x128xf32, #tpu.memory_space<vmem>>, vector<1x128xf32>
    %21 = vector.broadcast %20 : vector<1x128xf32> to vector<8x128xf32>
    %22 = arith.addf %19, %21 : vector<8x128xf32>
    %23 = math.tanh %22 : vector<8x128xf32>
    %c0_17 = arith.constant 0 : index
    %c0_18 = arith.constant 0 : index
    %24 = vector.load %arg8[%c0_17, %c0_18] : memref<8x128xf32, #tpu.memory_space<vmem>>, vector<8x128xf32>
    tpu.vector_store %arg8[%c0_17, %c0_18], %23 {strides = array<i32>} : memref<8x128xf32, #tpu.memory_space<vmem>>, vector<8x128xf32>,
    return
  }
  func.func @transform_0(%arg0: i32) -> (i32, i32) {
    %c0_i32 = arith.constant 0 : i32
    %c0_i32_0 = arith.constant 0 : i32
    return %arg0, %c0_i32 : i32, i32
  }
  func.func @transform_1(%arg0: i32) -> (i32, i32) {
    %c0_i32 = arith.constant 0 : i32
    %c0_i32_0 = arith.constant 0 : i32
    %c0_i32_1 = arith.constant 0 : i32
    return %c0_i32, %c0_i32_0 : i32, i32
  }
  func.func @transform_2(%arg0: i32) -> (i32, i32) {
    %c0_i32 = arith.constant 0 : i32
    %c0_i32_0 = arith.constant 0 : i32
    %c0_i32_1 = arith.constant 0 : i32
    return %c0_i32, %c0_i32_0 : i32, i32
  }
  func.func @transform_3(%arg0: i32) -> (i32, i32) {
    %c0_i32 = arith.constant 0 : i32
    %c0_i32_0 = arith.constant 0 : i32
    %c0_i32_1 = arith.constant 0 : i32
    return %c0_i32, %c0_i32_0 : i32, i32
  }
  func.func @transform_4(%arg0: i32) -> (i32, i32) {
    %c0_i32 = arith.constant 0 : i32
    %c0_i32_0 = arith.constant 0 : i32
    %c0_i32_1 = arith.constant 0 : i32
    return %c0_i32, %c0_i32_0 : i32, i32
  }
  func.func @transform_5(%arg0: i32) -> (i32, i32) {
    %c0_i32 = arith.constant 0 : i32
    %c0_i32_0 = arith.constant 0 : i32
    %c0_i32_1 = arith.constant 0 : i32
    return %c0_i32, %c0_i32_0 : i32, i32
  }
  func.func @transform_6(%arg0: i32) -> (i32, i32) {
    %c0_i32 = arith.constant 0 : i32
    %c0_i32_0 = arith.constant 0 : i32
    %c0_i32_1 = arith.constant 0 : i32
    return %c0_i32, %c0_i32_0 : i32, i32
  }
  func.func @transform_7(%arg0: i32) -> (i32, i32) {
    %c0_i32 = arith.constant 0 : i32
    %c0_i32_0 = arith.constant 0 : i32
    return %arg0, %c0_i32 : i32, i32
  }
}

</mosaic_0001>

<bundles_post_ra>
// kernel: tpu_custom_call.1
= control target key start
LH: loop header
LB: loop body
LE: loop exit
PB: predicated region body
PF: predicated region fallthrough
CT: control target
= control target key end

     0   :  { %12 = vsyncpa [#allocation3], 0  ;;  %s1005_s0 = inlined_call_operand.hbm [shape: f32[8,11], index: 0, kind: input, shape index: {}]   ;;  %s1006_s1 = inlined_call_operand.hbm [shape: bf16[11,256], index: 1, kind: input, shape index: {}]   ;;  %s1007_s2 = inlined_call_operand.vmem [shape: f32[1,256], index: 2, kind: input, shape index: {}]   ;;  %s1008_s3 = inlined_call_operand.hbm [shape: bf16[256,256], index: 3, kind: input, shape index: {}]   ;;  %s1009_s4 = inlined_call_operand.vmem [shape: f32[1,256], index: 4, kind: input, shape index: {}]   ;;  %s1010_s5 = inlined_call_operand.hbm [shape: bf16[256,128], index: 5, kind: input, shape index: {}]   ;;  %s1011_s6 = inlined_call_operand.vmem [shape: f32[1,128], index: 6, kind: input, shape index: {}]   ;;  %s1012_s7 = inlined_call_operand.hbm [shape: f32[8,128], index: 7, kind: output, shape index: {}]  }
   0x1   :  { %13 = vsyncpa [#allocation6], 0 }
   0x2   :  { %14 = vsyncpa [#allocation9], 0 }
   0x3   :  { %15 = vsyncpa [#allocation4], 0  ;;  %s879_s24 = smov [#allocation5]   ;;  %s761_s28 = scalar_lea.hbm %s1006_s1, 256 }
   0x4   :  { %s31_s25 = sshll.u32 %s879_s24, 4  ;;  %p762_p0 = scmp.ne.s32.totalorder %s1006_s1, %s761_s28  ;;  %s32_s25 = int_to_ptr.vmem [resolvable:$true] %s31_s25 }
   0x5   :  { %p765_p1 = scmp.lt.u32.totalorder %s761_s28, %s1006_s1 }
   0x7   :  { %p767_p2 = pnand %p765_p1, %p762_p0 }
   0x9   :  { %770 = shalt.err (!%p767_p2)
}
   0xa   :  { %s771_s10 = scalar_lea.vmem %s32_s25, 256  ;;  %p776_p4 = scmp.lt.s32.totalorder %s32_s25, %s32_s25 }
   0xb   :  { %p772_p3 = scmp.ne.s32.totalorder %s32_s25, %s771_s10  ;;  %p777_p5 = scmp.lt.s32.totalorder %s771_s10, %s771_s10 }
   0xd   :  { %p778_p6 = por %p777_p5, %p776_p4 }
   0xf   :  { %p779_p7 = pnand %p778_p6, %p772_p3 }
  0x11   :  { %782 = shalt.err (!%p779_p7)
}
  0x12   :  { %s880_s11 = smov 128   ;;  %s881_s12 = smov 8  }
  0x13   :  { %37 = dma.hbm_to_vmem [thread:$0]  %s1006_s1, 256, %s32_s25, [#allocation6], %s880_s11, %s880_s11, %s881_s12  }
  0x14   :  { %s882_s15 = smov [#allocation2]   ;;  %s883_s17 = smov [#allocation7]  }
  0x15   :  { %s22_s16 = sshll.u32 %s882_s15, 4  ;;  %s45_s18 = sshll.u32 %s883_s17, 4  ;;  %s23_s16 = int_to_ptr.vmem [resolvable:$true] %s22_s16  ;;  %s46_s18 = int_to_ptr.vmem [resolvable:$true] %s45_s18 }
  0x16   :  { %s783_s21 = scalar_lea.hbm %s1005_s0, 128 }
  0x17   :  { %p784_p8 = scmp.ne.s32.totalorder %s1005_s0, %s783_s21  ;;  %p787_p9 = scmp.lt.u32.totalorder %s783_s21, %s1005_s0 }
  0x19   :  { %p789_p10 = pnand %p787_p9, %p784_p8 }
  0x1b   :  { %792 = shalt.err (!%p789_p10)
}
  0x1c   :  { %s793_s1 = scalar_lea.vmem %s23_s16, 128  ;;  %p798_p12 = scmp.lt.s32.totalorder %s23_s16, %s23_s16 }
  0x1d   :  { %p794_p11 = scmp.ne.s32.totalorder %s23_s16, %s793_s1  ;;  %p799_p13 = scmp.lt.s32.totalorder %s793_s1, %s793_s1 }
  0x1f   :  { %p800_p0 = por %p799_p13, %p798_p12 }
  0x21   :  { %p801_p1 = pnand %p800_p0, %p794_p11 }
  0x23   :  { %804 = shalt.err (!%p801_p1)
}
  0x24   :  { %25 = dma.hbm_to_vmem [thread:$0]  %s1005_s0, 128, %s23_s16, [#allocation3]  }
  0x25   :  { %s805_s30 = scalar_lea.hbm %s1008_s3, 4096 }
  0x26   :  { %p806_p2 = scmp.ne.s32.totalorder %s1008_s3, %s805_s30  ;;  %p809_p3 = scmp.lt.u32.totalorder %s805_s30, %s1008_s3 }
  0x28   :  { %p811_p4 = pnand %p809_p3, %p806_p2 }
  0x2a   :  { %814 = shalt.err (!%p811_p4)
}
  0x2b   :  { %s815_s14 = scalar_lea.vmem %s46_s18, 4096  ;;  %p820_p6 = scmp.lt.s32.totalorder %s46_s18, %s46_s18 }
  0x2c   :  { %p816_p5 = scmp.ne.s32.totalorder %s46_s18, %s815_s14  ;;  %p821_p7 = scmp.lt.s32.totalorder %s815_s14, %s815_s14 }
  0x2e   :  { %p822_p8 = por %p821_p7, %p820_p6 }
  0x30   :  { %p823_p9 = pnand %p822_p8, %p816_p5 }
  0x32   :  { %826 = shalt.err (!%p823_p9)
}
  0x33   :  { %51 = dma.hbm_to_vmem [thread:$0]  %s1008_s3, 4096, %s46_s18, [#allocation6], %s880_s11, %s880_s11, %s881_s12  }
  0x34   :  { %s884_s16 = smov [#allocation8]   ;;  %s827_s21 = scalar_lea.hbm %s1010_s5, 2048 }
  0x35   :  { %s59_s17 = sshll.u32 %s884_s16, 4  ;;  %p828_p10 = scmp.ne.s32.totalorder %s1010_s5, %s827_s21  ;;  %s60_s17 = int_to_ptr.vmem [resolvable:$true] %s59_s17 }
  0x36   :  { %p831_p11 = scmp.lt.u32.totalorder %s827_s21, %s1010_s5 }
  0x38   :  { %p833_p12 = pnand %p831_p11, %p828_p10 }
  0x3a   :  { %836 = shalt.err (!%p833_p12)
}
  0x3b   :  { %s837_s1 = scalar_lea.vmem %s60_s17, 2048  ;;  %p842_p0 = scmp.lt.s32.totalorder %s60_s17, %s60_s17 }
  0x3c   :  { %p838_p13 = scmp.ne.s32.totalorder %s60_s17, %s837_s1  ;;  %p843_p1 = scmp.lt.s32.totalorder %s837_s1, %s837_s1 }
  0x3e   :  { %p844_p2 = por %p843_p1, %p842_p0 }
  0x40   :  { %p845_p3 = pnand %p844_p2, %p838_p13 }
  0x42   :  { %848 = shalt.err (!%p845_p3)
}
  0x43   :  { %s885_s3 = smov 64   ;;  %s886_s11 = smov 4  }
  0x44   :  { %65 = dma.hbm_to_vmem [thread:$0]  %s1010_s5, 2048, %s60_s17, [#allocation9], %s885_s3, %s885_s3, %s886_s11  }
  0x45   :  { %871 = dma.done.wait [#allocation3], 128  }
  0x46   :  { %872 = vsyncadd [#allocation3], 4294967168 }
  0x47   :  { %873 = dma.done.wait [#allocation6], 4352  }
  0x48   :  { %874 = vsyncadd [#allocation6], 4294962944 }
  0x49   :  { %875 = dma.done.wait [#allocation9], 2048  }
  0x4a   :  { %876 = vsyncadd [#allocation9], 4294965248  ;;  %vm109_vm0 = vcmask 1044480   ;;  %v887_v0 = vmov 0   ;;  %vm110_vm1 = vcmask 1045504   ;;  %v888_v1 = vmov 65535  }
  0x4b   :  { %151 = vmatprep.mubr.bf16.mxu0 %v887_v0  ;;  %v111_v2 = vsel %vm109_vm0, 4294967295, %v888_v1  ;;  %v692_v4 = vld [vmem:[#allocation5 + $0x4] ss:$8 sps:$4 sm:$0x3f]   ;;  %v81_v6 = vld [vmem:[#allocation2] sm:$0xff]  ;;  %vm105_vm2 = vcmask 89088   ;;  %v87_v54 = vlaneseq }
  0x4c   :  { %v112_v3 = vsel %vm110_vm1, %v111_v2, 0  ;;  %v694_v5 = vld [vmem:[#allocation5] ss:$8 sps:$4 sm:$0x3f]   ;;  %v695_v8 = vld [vmem:[#allocation7 + $0x4] ss:$8 sps:$4 sm:$0xff]   ;;  %v82_v12 = vpack.c.bf16 %v81_v6, %v81_v6 }
  0x4d   :  { %v117_v7 = vand.u32 %v692_v4, %v112_v3  ;;  %v697_v9 = vld [vmem:[#allocation7] ss:$8 sps:$4 sm:$0xff]   ;;  %v114_v10 = vand.u32 %v694_v5, %v112_v3  ;;  %v698_v11 = vld [vmem:[#allocation7 + $0x14] ss:$8 sps:$4 sm:$0xff]   ;;  %368 = vmatprep.subr.bf16.mxu1 %v695_v8  ;;  %v700_v13 = vld [vmem:[#allocation7 + $0x10] ss:$8 sps:$4 sm:$0xff]  }
  0x4e   :  { %369 = vmatpush1.bf16.msra.mxu1 %v697_v9  ;;  %v701_v14 = vld [vmem:[#allocation7 + $0x24] ss:$8 sps:$4 sm:$0xff]   ;;  %v703_v15 = vld [vmem:[#allocation7 + $0x20] ss:$8 sps:$4 sm:$0xff]   ;;  %v704_v16 = vld [vmem:[#allocation7 + $0x34] ss:$8 sps:$4 sm:$0xff]  }
  0x4f   :  { %119 = vmatprep.subr.bf16.mxu0 %v117_v7  ;;  %370 = vmatprep.subr.bf16.mxu1 %v698_v11  ;;  %v706_v17 = vld [vmem:[#allocation7 + $0x30] ss:$8 sps:$4 sm:$0xff]   ;;  %v707_v18 = vld [vmem:[#allocation7 + $0x44] ss:$8 sps:$4 sm:$0xff]   ;;  %v709_v19 = vld [vmem:[#allocation7 + $0x40] ss:$8 sps:$4 sm:$0xff]  }
  0x50   :  { %120 = vmatpush1.bf16.msra.mxu0 %v114_v10  ;;  %v710_v20 = vld [vmem:[#allocation7 + $0x54] ss:$8 sps:$4 sm:$0xff]   ;;  %v712_v21 = vld [vmem:[#allocation7 + $0x50] ss:$8 sps:$4 sm:$0xff]   ;;  %v713_v22 = vld [vmem:[#allocation7 + $0x64] ss:$8 sps:$4 sm:$0xff]  }
  0x51   :  { %v715_v23 = vld [vmem:[#allocation7 + $0x60] ss:$8 sps:$4 sm:$0xff]   ;;  %v716_v24 = vld [vmem:[#allocation7 + $0x74] ss:$8 sps:$4 sm:$0xff]   ;;  %v718_v25 = vld [vmem:[#allocation7 + $0x70] ss:$8 sps:$4 sm:$0xff]  }
  0x52   :  { %371 = vmatpush1.bf16.msra.mxu1 %v700_v13  ;;  %v719_v26 = vld [vmem:[#allocation7 + $0x84] ss:$8 sps:$4 sm:$0xff]   ;;  %v721_v27 = vld [vmem:[#allocation7 + $0x80] ss:$8 sps:$4 sm:$0xff]   ;;  %v722_v28 = vld [vmem:[#allocation7 + $0x94] ss:$8 sps:$4 sm:$0xff]  }
  0x53   :  { %609 = vmatmul.mubr.msk.bf16.vlgmr.msra.gmra.mrb[0].mxu0 %vm105_vm2, %v82_v12  ;;  %372 = vmatprep.subr.bf16.mxu1 %v701_v14  ;;  %v724_v29 = vld [vmem:[#allocation7 + $0x90] ss:$8 sps:$4 sm:$0xff]   ;;  %v725_v30 = vld [vmem:[#allocation7 + $0xa4] ss:$8 sps:$4 sm:$0xff]   ;;  %v727_v31 = vld [vmem:[#allocation7 + $0xa0] ss:$8 sps:$4 sm:$0xff]  }
  0x54   :  { %v728_v32 = vld [vmem:[#allocation7 + $0xb4] ss:$8 sps:$4 sm:$0xff]   ;;  %v730_v33 = vld [vmem:[#allocation7 + $0xb0] ss:$8 sps:$4 sm:$0xff]   ;;  %v731_v34 = vld [vmem:[#allocation7 + $0xc4] ss:$8 sps:$4 sm:$0xff]  }
  0x55   :  { %v733_v35 = vld [vmem:[#allocation7 + $0xc0] ss:$8 sps:$4 sm:$0xff]   ;;  %v734_v36 = vld [vmem:[#allocation7 + $0xd4] ss:$8 sps:$4 sm:$0xff]   ;;  %v736_v37 = vld [vmem:[#allocation7 + $0xd0] ss:$8 sps:$4 sm:$0xff]  }
  0x56   :  { %373 = vmatpush1.bf16.msra.mxu1 %v703_v15  ;;  %v737_v38 = vld [vmem:[#allocation7 + $0xe4] ss:$8 sps:$4 sm:$0xff]   ;;  %v739_v39 = vld [vmem:[#allocation7 + $0xe0] ss:$8 sps:$4 sm:$0xff]   ;;  %v740_v40 = vld [vmem:[#allocation7 + $0xf4] ss:$8 sps:$4 sm:$0xff]  }
  0x57   :  { %374 = vmatprep.subr.bf16.mxu1 %v704_v16  ;;  %v742_v41 = vld [vmem:[#allocation7 + $0xf0] ss:$8 sps:$4 sm:$0xff]   ;;  %v743_v42 = vld [vmem:[#allocation8 + $0x40] sm:$0xff]   ;;  %v745_v44 = vld [vmem:[#allocation8 + $0x48] sm:$0xff]   ;;  %v88_v55 = vshrl.u32 %v87_v54, 7 }
  0x58   :  { %v744_v43 = vld [vmem:[#allocation8] sm:$0xff]   ;;  %659 = vmatprep.subr.bf16.mxu0 %v743_v42  ;;  %v746_v45 = vld [vmem:[#allocation8 + $0x8] sm:$0xff]   ;;  %v747_v46 = vld [vmem:[#allocation8 + $0x50] sm:$0xff]  }
  0x59   :  { %660 = vmatpush3.bf16.msra.mxu0 %v744_v43  ;;  %v748_v47 = vld [vmem:[#allocation8 + $0x10] sm:$0xff]   ;;  %v749_v48 = vld [vmem:[#allocation8 + $0x58] sm:$0xff]   ;;  %v751_v50 = vld [vmem:[#allocation8 + $0x60] sm:$0xff]   ;;  %v89_v56 = vsub.s32 0, %v88_v55  ;;  %v93_v58 = vsub.s32 1, %v88_v55 }
  0x5a   :  { %375 = vmatpush1.bf16.msra.mxu1 %v706_v17  ;;  %661 = vmatprep.subr.bf16.mxu0 %v745_v44  ;;  %v750_v49 = vld [vmem:[#allocation8 + $0x18] sm:$0xff]   ;;  %v752_v51 = vld [vmem:[#allocation8 + $0x20] sm:$0xff]   ;;  %v753_v52 = vld [vmem:[#allocation8 + $0x68] sm:$0xff]  }
  0x5b   :  { %376 = vmatprep.subr.bf16.mxu1 %v707_v18  ;;  %v754_v53 = vld [vmem:[#allocation8 + $0x28] sm:$0xff]   ;;  %v755_v7 = vld [vmem:[#allocation8 + $0x70] sm:$0xff]   ;;  %v757_v9 = vld [vmem:[#allocation8 + $0x78] sm:$0xff]  }
  0x5c   :  { %v85_v57 = vld [vmem:[%s1007_s2] sm:$0x3]  ;;  %v756_v8 = vld [vmem:[#allocation8 + $0x30] sm:$0xff]   ;;  %v758_v10 = vld [vmem:[#allocation8 + $0x38] sm:$0xff]  }
  0x5d   :  { %662 = vmatpush3.bf16.msra.mxu0 %v746_v45  ;;  %v90_v59 = vrot.slane %v85_v57, %v89_v56  ;;  %v94_v60 = vrot.slane %v85_v57, %v93_v58  ;;  %v196_v11 = vld [vmem:[%s1009_s4] sm:$0x3]  ;;  %s889_s4 = smov [#allocation10]  }
  0x5e   :  { %377 = vmatpush1.bf16.msra.mxu1 %v709_v19  ;;  %663 = vmatprep.subr.bf16.mxu0 %v747_v46  ;;  %v201_v12 = vrot.slane %v196_v11, %v89_v56  ;;  %v205_v13 = vrot.slane %v196_v11, %v93_v58  ;;  %s596_s30 = sshll.u32 %s889_s4, 4  ;;  %s597_s30 = int_to_ptr.vmem [resolvable:$true] %s596_s30 }
  0x5f   :  { %378 = vmatprep.subr.bf16.mxu1 %v710_v20  ;;  %s849_s8 = scalar_lea.vmem %s597_s30, 128  ;;  %p854_p5 = scmp.lt.s32.totalorder %s597_s30, %s597_s30 }
  0x60   :  { %p850_p4 = scmp.ne.s32.totalorder %s597_s30, %s849_s8  ;;  %p855_p6 = scmp.lt.s32.totalorder %s849_s8, %s849_s8 }
  0x61   :  { %664 = vmatpush3.bf16.msra.mxu0 %v748_v47 }
  0x62   :  { %379 = vmatpush1.bf16.msra.mxu1 %v712_v21  ;;  %665 = vmatprep.subr.bf16.mxu0 %v749_v48  ;;  %p856_p7 = por %p855_p6, %p854_p5 }
  0x63   :  { %380 = vmatprep.subr.bf16.mxu1 %v713_v22 }
  0x64   :  { %p857_p8 = pnand %p856_p7, %p850_p4 }
  0x65   :  { %666 = vmatpush3.bf16.msra.mxu0 %v750_v49 }
  0x66   :  { %381 = vmatpush1.bf16.msra.mxu1 %v715_v23  ;;  %667 = vmatprep.subr.bf16.mxu0 %v751_v50 }
  0x67   :  { %382 = vmatprep.subr.bf16.mxu1 %v716_v24 }
  0x69   :  { %668 = vmatpush3.bf16.msra.mxu0 %v752_v51 }
  0x6a   :  { %383 = vmatpush1.bf16.msra.mxu1 %v718_v25  ;;  %669 = vmatprep.subr.bf16.mxu0 %v753_v52  ;;  %v642_v25 = vld [vmem:[%s1011_s6] ss:$0 sm:$0xff] }
  0x6b   :  { %384 = vmatprep.subr.bf16.mxu1 %v719_v26 }
  0x6d   :  { %670 = vmatpush3.bf16.msra.mxu0 %v754_v53 }
  0x6e   :  { %385 = vmatpush1.bf16.msra.mxu1 %v721_v27  ;;  %671 = vmatprep.subr.bf16.mxu0 %v755_v7 }
  0x6f   :  { %386 = vmatprep.subr.bf16.mxu1 %v722_v28 }
  0x71   :  { %672 = vmatpush3.bf16.msra.mxu0 %v756_v8 }
  0x72   :  { %387 = vmatpush1.bf16.msra.mxu1 %v724_v29  ;;  %673 = vmatprep.subr.bf16.mxu0 %v757_v9 }
  0x73   :  { %388 = vmatprep.subr.bf16.mxu1 %v725_v30 }
  0x75   :  { %674 = vmatpush3.bf16.msra.mxu0 %v758_v10 }
  0x76   :  { %389 = vmatpush1.bf16.msra.mxu1 %v727_v31 }
  0x77   :  { %390 = vmatprep.subr.bf16.mxu1 %v728_v32 }
  0x7a   :  { %391 = vmatpush1.bf16.msra.mxu1 %v730_v33 }
  0x7b   :  { %392 = vmatprep.subr.bf16.mxu1 %v731_v34 }
  0x7e   :  { %393 = vmatpush1.bf16.msra.mxu1 %v733_v35 }
  0x7f   :  { %394 = vmatprep.subr.bf16.mxu1 %v734_v36 }
  0x82   :  { %395 = vmatpush1.bf16.msra.mxu1 %v736_v37 }
  0x83   :  { %396 = vmatprep.subr.bf16.mxu1 %v737_v38 }
  0x86   :  { %397 = vmatpush1.bf16.msra.mxu1 %v739_v39 }
  0x87   :  { %398 = vmatprep.subr.bf16.mxu1 %v740_v40 }
  0x8a   :  { %399 = vmatpush1.bf16.msra.mxu1 %v742_v41 }
 0x126   :  { %v153_v61 = vpop.f32.mrb[0].mxu0 }
 0x127   :  { %v154_v62 = vadd.f32 %v153_v61, %v90_v59  ;;  %v155_v63 = vpop.f32.mrb[1].mxu0 }
 0x128   :  { %v156_v0 = vadd.f32 %v155_v63, %v94_v60  ;;  %v157_v1 = vpop.f32.mrb[2].mxu0 }
 0x129   :  { %v160_v2 = vmax.f32 %v154_v62, 0.0  ;;  %v158_v3 = vpop.f32.mrb[3].mxu0 }
 0x12a   :  { %v161_v4 = vmax.f32 %v156_v0, 0.0 }
 0x12b   :  { %v162_v6 = vpack.c.bf16 %v160_v2, %v160_v2 }
 0x12c   :  { %v163_v5 = vpack.c.bf16 %v161_v4, %v161_v4 }
 0x12e   :  { %400 = vmatprep.mubr.bf16.mxu1 %v163_v5 }
 0x12f   :  { %401 = vmatmul.mubr.bf16.vlgmr.msra.gmra.mrb[0].mxu1 %v162_v6 }
 0x202   :  { %v402_v14 = vpop.f32.mrb[0].mxu1 }
 0x203   :  { %v403_v15 = vadd.f32 %v402_v14, %v201_v12  ;;  %v404_v16 = vpop.f32.mrb[1].mxu1 }
 0x204   :  { %v405_v17 = vadd.f32 %v404_v16, %v205_v13  ;;  %v406_v18 = vpop.f32.mrb[2].mxu1 }
 0x205   :  { %v409_v19 = vmax.f32 %v403_v15, 0.0  ;;  %v407_v20 = vpop.f32.mrb[3].mxu1 }
 0x206   :  { %v410_v21 = vmax.f32 %v405_v17, 0.0 }
 0x207   :  { %v411_v23 = vpack.c.bf16 %v409_v19, %v409_v19 }
 0x208   :  { %v412_v22 = vpack.c.bf16 %v410_v21, %v410_v21 }
 0x20a   :  { %580 = vmatprep.mubr.bf16.mxu0 %v412_v22 }
 0x20b   :  { %581 = vmatmul.mubr.bf16.vlgmr.msra.gmra.mrb[4].mxu0 %v411_v23 }
 0x2de   :  { %v675_v24 = vpop.f32.mrb[4].mxu0 }
 0x2df   :  { %v676_v26 = vpop.f32.mrb[5].mxu0 }
 0x2e0   :  { %v677_v27 = vadd.f32 %v676_v26, %v675_v24  ;;  %v678_v28 = vpop.f32.mrb[6].mxu0 }
 0x2e1   :  { %v679_v29 = vpop.f32.mrb[7].mxu0 }
 0x2e2   :  { %v583_v30 = vadd.f32 %v677_v27, %v642_v25 }
 0x2e4   :  { %759 = vtanh.f32 %v583_v30 }
 0x2ee   :  { %v760_v31 = vpop.eup %759 }
 0x2ef   :  { %589 = vst [vmem:[#allocation10] sm:$0xff] %v760_v31 }
 0x2f0   :  { %860 = shalt.err (!%p857_p8)
}
 0x2f1   :  { %s861_s10 = scalar_lea.hbm %s1012_s7, 128 }
 0x2f2   :  { %p862_p9 = scmp.ne.s32.totalorder %s1012_s7, %s861_s10  ;;  %p865_p10 = scmp.lt.u32.totalorder %s861_s10, %s1012_s7 }
 0x2f4   :  { %p867_p11 = pnand %p865_p10, %p862_p9 }
 0x2f6   :  { %870 = shalt.err (!%p867_p11)
}
 0x2f7   :  { %599 = dma.vmem_to_hbm [thread:$0]  %s597_s30, 128, %s1012_s7, [#allocation4]  }
 0x2f8   :  { %877 = dma.done.wait [#allocation4], 128  }
 0x2f9   :  { %878 = vsyncadd [#allocation4], 4294967168 }
 0x2fa   :  { %603 = vsyncpa [#allocation3], 1 }
 0x2fb   :  { %604 = vsyncpa [#allocation6], 1 }
 0x2fc   :  { %605 = vsyncpa [#allocation9], 1 }
 0x2fd   :  { %606 = vsyncpa [#allocation4], 1 }

</bundles_post_ra>
